<compile_context>
chip_gen: v7x
topology: tpu7x:2x2x1
jax: 0.10.0
libtpu: 0.0.40
codegen_flags: <defaults>
</compile_context>

<pallas_src>
import functools

import jax
import jax.numpy as jnp
from jax import lax
from jax.experimental import pallas as pl
from jax.experimental.pallas import tpu as pltpu


def _cf_kernel(num_items,
               idx_ref,        # (block_b, 1) int32 per-tile indices     (VMEM)
               pers_tbl_ref,   # (num_items, H) personality table        (VMEM, resident)
               comm_tbl_ref,   # (num_items, H) commonality table        (VMEM, resident)
               w_ref,          # (1, H) linear weight row                (VMEM, resident)
               b_ref,          # (1, 1) bias scalar                      (SMEM)
               pers_ref,       # (block_b, H) gathered personality       (output tile)
               comm_ref,       # (block_b, H) gathered commonality       (output tile)
               rating_ref):    # (block_b, 1) rating                     (output tile)
    block_b = idx_ref.shape[0]
    tbl_dtype = pers_tbl_ref.dtype

    # Vectorized one-hot gather on the MXU: onehot[b, n] = (n == idx[b]).
    # Out-of-range / padded indices match nothing -> zero rows (never written
    # back for padded rows of a ragged last tile).
    idx = idx_ref[...]                                               # (block_b, 1)
    iota = lax.broadcasted_iota(jnp.int32, (block_b, num_items), 1)  # (block_b, num_items)
    onehot = (iota == idx).astype(tbl_dtype)

    pers = jnp.dot(onehot, pers_tbl_ref[...], preferred_element_type=jnp.float32)
    comm = jnp.dot(onehot, comm_tbl_ref[...], preferred_element_type=jnp.float32)
    pers_ref[...] = pers.astype(pers_ref.dtype)
    comm_ref[...] = comm.astype(comm_ref.dtype)

    # Fuse + matvec + sigmoid, all f32.  keepdims reduce -> (block_b, 1) born in
    # the output layout (no lane transpose).  H=32 uses 32/128 lanes, but the
    # kernel is HBM-writeback bound so the VPU/XLU slack is irrelevant.
    fused = pers + comm                                              # (block_b, H) f32
    w = w_ref[...].astype(jnp.float32)                               # (1, H)
    logits = jnp.sum(fused * w, axis=1, keepdims=True) + b_ref[0, 0]
    rating_ref[...] = jax.nn.sigmoid(logits).astype(rating_ref.dtype)


def _default_block_b(B, num_items):
    # Single tile for small batches (per-step overhead ~0.35us would dominate);
    # otherwise target >= 4 grid steps so each of v7x's two TensorCores
    # pipelines >= 2 steps, keep tiles 128-aligned, and roughly cap the
    # (block_b, num_items) one-hot intermediate.
    if B <= 512:
        return B
    quarter = ((pl.cdiv(B, 4) + 127) // 128) * 128
    onehot_cap = max(128, ((8 << 20) // (4 * num_items)) // 128 * 128)
    return max(128, min(quarter, 1024, onehot_cap))


def _vmem_limit_bytes(num_items, H, block_b, tbl_itemsize, out_itemsize):
    tables = 2 * num_items * H * tbl_itemsize                  # single-buffered (Buffered(1))
    weight = H * 4
    idx = 2 * block_b * 4                                      # double-buffered index blocks
    outs = 2 * (2 * block_b * H * out_itemsize + block_b * 4)  # double-buffered outputs
    onehot = block_b * num_items * 4
    interm = 4 * block_b * H * 4                               # pers/comm/fused f32 temps
    total = tables + weight + idx + outs + onehot + interm + (4 << 20)
    # v5e/v6e have 128 MiB physical VMEM; v7x only 64 MiB.  Tables too large for
    # this budget should use the streaming fallback (see TODO below).
    return int(min(max(total, 16 << 20), 96 << 20))


def personalized_collabo_filter(item_indices, pers_table, comm_table,
                                user_w, user_b, *, block_b=None):
    num_items, H = pers_table.shape
    assert comm_table.shape == (num_items, H)
    B = item_indices.shape[0]

    if block_b is None:
        block_b = _default_block_b(B, num_items)
    if block_b >= B:
        block_b = B
    else:
        block_b = max(128, (block_b // 128) * 128)   # lane/sublane aligned tiles
        if block_b >= B:
            block_b = B
    num_tiles = pl.cdiv(B, block_b)

    idx2d = item_indices.astype(jnp.int32).reshape(B, 1)
    w_row = jnp.asarray(user_w, jnp.float32).reshape(1, H)
    b2d = jnp.asarray(user_b, jnp.float32).reshape(1, 1)

    vmem_bytes = _vmem_limit_bytes(num_items, H, block_b,
                                   pers_table.dtype.itemsize,
                                   pers_table.dtype.itemsize)

    kernel = functools.partial(_cf_kernel, num_items)

    # Constant-index inputs never change across the grid -> single-buffer them.
    def _const_spec(shape):
        return pl.BlockSpec(shape, lambda i: (0,) * len(shape),
                            pipeline_mode=pl.Buffered(1))

    # TODO(synk): for tables too large to keep VMEM-resident, stream table tiles
    # over a reduction grid axis and accumulate the one-hot matmul per chunk
    # (NOT per-row DMA gathers -- descriptor overhead would dominate).
    pers, comm, rating = pl.pallas_call(
        kernel,
        out_shape=(
            jax.ShapeDtypeStruct((B, H), pers_table.dtype),
            jax.ShapeDtypeStruct((B, H), comm_table.dtype),
            jax.ShapeDtypeStruct((B, 1), jnp.float32),
        ),
        grid_spec=pltpu.PrefetchScalarGridSpec(
            num_scalar_prefetch=0,
            grid=(num_tiles,),
            in_specs=[
                pl.BlockSpec((block_b, 1), lambda i: (i, 0)),          # per-tile indices
                _const_spec((num_items, H)),                           # personality table
                _const_spec((num_items, H)),                           # commonality table
                _const_spec((1, H)),                                   # linear weight
                pl.BlockSpec(memory_space=pltpu.MemorySpace.SMEM),     # bias scalar
            ],
            out_specs=[
                pl.BlockSpec((block_b, H), lambda i: (i, 0)),
                pl.BlockSpec((block_b, H), lambda i: (i, 0)),
                pl.BlockSpec((block_b, 1), lambda i: (i, 0)),
            ],
        ),
        compiler_params=pltpu.CompilerParams(
            dimension_semantics=("parallel",),
            vmem_limit_bytes=vmem_bytes,
        ),
    )(idx2d, pers_table, comm_table, w_row, b2d)

    return rating, pers, comm


if __name__ == "__main__":
    num_items = 16
    item_hidden_dim = 32
    batch = 8

    key = jax.random.PRNGKey(0)
    k1, k2, k3, k4, k5, k6 = jax.random.split(key, 6)

    # Deterministic parameter init (Embedding ~ N(0,1), Linear ~ U(+-1/sqrt(H))).
    pers_table = jax.random.normal(k1, (num_items, item_hidden_dim), jnp.float32)
    comm_table = jax.random.normal(k2, (num_items, item_hidden_dim), jnp.float32)
    bound = 1.0 / (item_hidden_dim ** 0.5)
    user_w = jax.random.uniform(k3, (1, item_hidden_dim), jnp.float32, -bound, bound)
    user_b = jax.random.uniform(k4, (1, 1), jnp.float32, -bound, bound)

    def reference(idx):
        p = pers_table[idx]
        c = comm_table[idx]
        r = jax.nn.sigmoid((p + c) @ user_w.T + user_b.reshape(1, 1))
        return r, p, c

    # Tolerances absorb the MXU multi-pass f32 emulation of the one-hot gather
    # (worst case ~5e-3 absolute); wrong-row gathers would give O(1) errors.
    TOL = dict(atol=5e-3, rtol=5e-3)

    # Case 1: small single-tile batch.
    item_indices = jax.random.randint(k5, (batch,), 0, num_items, jnp.int32)
    rating, pers, comm = personalized_collabo_filter(
        item_indices, pers_table, comm_table, user_w, user_b)
    jax.block_until_ready((rating, pers, comm))
    r_ref, p_ref, c_ref = reference(item_indices)
    assert rating.shape == (batch, 1)
    assert pers.shape == (batch, item_hidden_dim)
    assert comm.shape == (batch, item_hidden_dim)
    assert jnp.allclose(pers, p_ref, **TOL), "personality mismatch"
    assert jnp.allclose(comm, c_ref, **TOL), "commonality mismatch"
    assert jnp.allclose(rating, r_ref, **TOL), "rating mismatch"

    # Case 2: ragged multi-tile batch (B not a multiple of block_b) to exercise
    # edge-block masking of the outputs.
    batch2 = 300
    idx2 = jax.random.randint(k6, (batch2,), 0, num_items, jnp.int32)
    rating2, pers2, comm2 = personalized_collabo_filter(
        idx2, pers_table, comm_table, user_w, user_b, block_b=128)
    jax.block_until_ready((rating2, pers2, comm2))
    r2_ref, p2_ref, c2_ref = reference(idx2)
    assert rating2.shape == (batch2, 1)
    assert jnp.allclose(pers2, p2_ref, **TOL), "ragged personality mismatch"
    assert jnp.allclose(comm2, c2_ref, **TOL), "ragged commonality mismatch"
    assert jnp.allclose(rating2, r2_ref, **TOL), "ragged rating mismatch"

    print("KERNEL_OK")
</pallas_src>

<mosaic_0001>
module attributes {stable_mosaic.version = 11 : i64} {
  func.func @_cf_kernel(%arg0: i32, %arg1: memref<8x1xi32, #tpu.memory_space<vmem>>, %arg2: memref<16x32xf32, #tpu.memory_space<vmem>>, %arg3: memref<16x32xf32, #tpu.memory_space<vmem>>, %arg4: memref<1x32xf32, #tpu.memory_space<vmem>>, %arg5: memref<1x1xf32, #tpu.memory_space<smem>>, %arg6: memref<8x32xf32, #tpu.memory_space<vmem>>, %arg7: memref<8x32xf32, #tpu.memory_space<vmem>>, %arg8: memref<8x1xf32, #tpu.memory_space<vmem>>) attributes {dimension_semantics = [#tpu.dimension_semantics<parallel>], iteration_bounds = array<i64: 1>, scalar_prefetch = 0 : i64, scratch_operands = 0 : i64, tpu.core_type = #tpu.core_type<tc>, window_params = [{transform_indices = @transform_0, window_bounds = array<i64: 8, 1>}, {pipeline_mode = #tpu.pipeline_mode<synchronous>, transform_indices = @transform_1, window_bounds = array<i64: 16, 32>}, {pipeline_mode = #tpu.pipeline_mode<synchronous>, transform_indices = @transform_2, window_bounds = array<i64: 16, 32>}, {pipeline_mode = #tpu.pipeline_mode<synchronous>, transform_indices = @transform_3, window_bounds = array<i64: 1, 32>}, {transform_indices = @transform_4, window_bounds = array<i64: 1, 1>}, {transform_indices = @transform_5, window_bounds = array<i64: 8, 32>}, {transform_indices = @transform_6, window_bounds = array<i64: 8, 32>}, {transform_indices = @transform_7, window_bounds = array<i64: 8, 1>}]} {
    %c0 = arith.constant 0 : index
    %c0_0 = arith.constant 0 : index
    %0 = vector.load %arg1[%c0, %c0_0] : memref<8x1xi32, #tpu.memory_space<vmem>>, vector<8x1xi32>
    %1 = tpu.iota {dimensions = array<i32: 1>} : vector<8x16xi32>
    %2 = vector.broadcast %0 : vector<8x1xi32> to vector<8x16xi32>
    %3 = arith.cmpi eq, %1, %2 : vector<8x16xi32>
    %4 = arith.extui %3 : vector<8x16xi1> to vector<8x16xi32>
    %5 = arith.sitofp %4 : vector<8x16xi32> to vector<8x16xf32>
    %c0_1 = arith.constant 0 : index
    %c0_2 = arith.constant 0 : index
    %6 = vector.load %arg2[%c0_1, %c0_2] : memref<16x32xf32, #tpu.memory_space<vmem>>, vector<16x32xf32>
    %cst = arith.constant dense<0.000000e+00> : vector<8x32xf32>
    %7 = tpu.matmul %5, %6, %cst {dimension_numbers = #tpu.dot_dimension_numbers<[1], [0], [0], [1], [0, 0, 1, 1], [], []>} : vector<8x16xf32>, vector<16x32xf32>, vector<8x32xf32> -> vector<8x32xf32>
    %c0_3 = arith.constant 0 : index
    %c0_4 = arith.constant 0 : index
    %8 = vector.load %arg3[%c0_3, %c0_4] : memref<16x32xf32, #tpu.memory_space<vmem>>, vector<16x32xf32>
    %cst_5 = arith.constant dense<0.000000e+00> : vector<8x32xf32>
    %9 = tpu.matmul %5, %8, %cst_5 {dimension_numbers = #tpu.dot_dimension_numbers<[1], [0], [0], [1], [0, 0, 1, 1], [], []>} : vector<8x16xf32>, vector<16x32xf32>, vector<8x32xf32> -> vector<8x32xf32>
    %c0_6 = arith.constant 0 : index
    %c0_7 = arith.constant 0 : index
    %10 = vector.load %arg6[%c0_6, %c0_7] : memref<8x32xf32, #tpu.memory_space<vmem>>, vector<8x32xf32>
    tpu.vector_store %arg6[%c0_6, %c0_7], %7 {strides = array<i32>} : memref<8x32xf32, #tpu.memory_space<vmem>>, vector<8x32xf32>,
    %c0_8 = arith.constant 0 : index
    %c0_9 = arith.constant 0 : index
    %11 = vector.load %arg7[%c0_8, %c0_9] : memref<8x32xf32, #tpu.memory_space<vmem>>, vector<8x32xf32>
    tpu.vector_store %arg7[%c0_8, %c0_9], %9 {strides = array<i32>} : memref<8x32xf32, #tpu.memory_space<vmem>>, vector<8x32xf32>,
    %12 = arith.addf %7, %9 : vector<8x32xf32>
    %c0_10 = arith.constant 0 : index
    %c0_11 = arith.constant 0 : index
    %13 = vector.load %arg4[%c0_10, %c0_11] : memref<1x32xf32, #tpu.memory_space<vmem>>, vector<1x32xf32>
    %14 = vector.broadcast %13 : vector<1x32xf32> to vector<8x32xf32>
    %15 = arith.mulf %12, %14 : vector<8x32xf32>
    %cst_12 = arith.constant dense<0.000000e+00> : vector<8xf32>
    %16 = vector.multi_reduction <add>, %15, %cst_12 [1] : vector<8x32xf32> to vector<8xf32>
    %17 = vector.shape_cast %16 : vector<8xf32> to vector<8x1xf32>
    %c0_13 = arith.constant 0 : index
    %c0_14 = arith.constant 0 : index
    %18 = memref.load %arg5[%c0_13, %c0_14] : memref<1x1xf32, #tpu.memory_space<smem>>
    %19 = vector.broadcast %18 : f32 to vector<8x1xf32>
    %20 = arith.addf %17, %19 : vector<8x1xf32>
    %21 = arith.negf %20 : vector<8x1xf32>
    %22 = math.exp %21 : vector<8x1xf32>
    %cst_15 = arith.constant 1.000000e+00 : f32
    %23 = vector.broadcast %cst_15 : f32 to vector<8x1xf32>
    %24 = arith.addf %23, %22 : vector<8x1xf32>
    %25 = arith.divf %23, %24 : vector<8x1xf32>
    %c0_16 = arith.constant 0 : index
    %c0_17 = arith.constant 0 : index
    %26 = vector.load %arg8[%c0_16, %c0_17] : memref<8x1xf32, #tpu.memory_space<vmem>>, vector<8x1xf32>
    tpu.vector_store %arg8[%c0_16, %c0_17], %25 {strides = array<i32>} : memref<8x1xf32, #tpu.memory_space<vmem>>, vector<8x1xf32>,
    return
  }
  func.func @transform_0(%arg0: i32) -> (i32, i32) {
    %c0_i32 = arith.constant 0 : i32
    %c0_i32_0 = arith.constant 0 : i32
    return %arg0, %c0_i32 : i32, i32
  }
  func.func @transform_1(%arg0: i32) -> (i32, i32) {
    %c0_i32 = arith.constant 0 : i32
    %c0_i32_0 = arith.constant 0 : i32
    %c0_i32_1 = arith.constant 0 : i32
    return %c0_i32, %c0_i32_0 : i32, i32
  }
  func.func @transform_2(%arg0: i32) -> (i32, i32) {
    %c0_i32 = arith.constant 0 : i32
    %c0_i32_0 = arith.constant 0 : i32
    %c0_i32_1 = arith.constant 0 : i32
    return %c0_i32, %c0_i32_0 : i32, i32
  }
  func.func @transform_3(%arg0: i32) -> (i32, i32) {
    %c0_i32 = arith.constant 0 : i32
    %c0_i32_0 = arith.constant 0 : i32
    %c0_i32_1 = arith.constant 0 : i32
    return %c0_i32, %c0_i32_0 : i32, i32
  }
  func.func @transform_4(%arg0: i32) -> (i32, i32) {
    %c0_i32 = arith.constant 0 : i32
    %c0_i32_0 = arith.constant 0 : i32
    %c0_i32_1 = arith.constant 0 : i32
    return %c0_i32, %c0_i32_0 : i32, i32
  }
  func.func @transform_5(%arg0: i32) -> (i32, i32) {
    %c0_i32 = arith.constant 0 : i32
    %c0_i32_0 = arith.constant 0 : i32
    return %arg0, %c0_i32 : i32, i32
  }
  func.func @transform_6(%arg0: i32) -> (i32, i32) {
    %c0_i32 = arith.constant 0 : i32
    %c0_i32_0 = arith.constant 0 : i32
    return %arg0, %c0_i32 : i32, i32
  }
  func.func @transform_7(%arg0: i32) -> (i32, i32) {
    %c0_i32 = arith.constant 0 : i32
    %c0_i32_0 = arith.constant 0 : i32
    return %arg0, %c0_i32 : i32, i32
  }
}

</mosaic_0001>

<bundles_post_ra>
// kernel: tpu_custom_call.1
= control target key start
LH: loop header
LB: loop body
LE: loop exit
PB: predicated region body
PF: predicated region fallthrough
CT: control target
= control target key end

     0   :  { %14 = vsyncpa [#allocation4], 0  ;;  %s476_s0 = inlined_call_operand.vmem [shape: s32[8,1], index: 0, kind: input, shape index: {}]   ;;  %s477_s1 = inlined_call_operand.vmem [shape: f32[16,32], index: 1, kind: input, shape index: {}]   ;;  %s478_s2 = inlined_call_operand.hbm [shape: f32[16,32], index: 2, kind: input, shape index: {}]   ;;  %s479_s3 = inlined_call_operand.vmem [shape: f32[1,32], index: 3, kind: input, shape index: {}]   ;;  %s480_s4 = inlined_call_operand.<no memory space> [shape: f32[1,1], index: 4, kind: input, shape index: {}]   ;;  %s481_s5 = inlined_call_operand.hbm [shape: f32[8,32], index: 5, kind: output, shape index: {0}]   ;;  %s482_s6 = inlined_call_operand.hbm [shape: f32[8,32], index: 6, kind: output, shape index: {1}]   ;;  %s483_s7 = inlined_call_operand.vmem [shape: f32[8,1], index: 7, kind: output, shape index: {2}]  }
   0x1   :  { %15 = vsyncpa [#allocation5], 0 }
   0x2   :  { %16 = vsyncpa [#allocation8], 0  ;;  %s373_s24 = smov [#allocation3]   ;;  %s301_s28 = scalar_lea.hbm %s478_s2, 256 }
   0x3   :  { %s26_s25 = sshll.u32 %s373_s24, 4  ;;  %p302_p0 = scmp.ne.s32.totalorder %s478_s2, %s301_s28  ;;  %s27_s25 = int_to_ptr.vmem [resolvable:$true] %s26_s25 }
   0x4   :  { %p305_p1 = scmp.lt.u32.totalorder %s301_s28, %s478_s2 }
   0x6   :  { %p307_p2 = pnand %p305_p1, %p302_p0 }
   0x8   :  { %310 = shalt.err (!%p307_p2)
}
   0x9   :  { %s311_s10 = scalar_lea.vmem %s27_s25, 256  ;;  %p316_p4 = scmp.lt.s32.totalorder %s27_s25, %s27_s25 }
   0xa   :  { %p312_p3 = scmp.ne.s32.totalorder %s27_s25, %s311_s10  ;;  %p317_p5 = scmp.lt.s32.totalorder %s311_s10, %s311_s10 }
   0xc   :  { %p318_p6 = por %p317_p5, %p316_p4 }
   0xe   :  { %p319_p7 = pnand %p318_p6, %p312_p3 }
  0x10   :  { %322 = shalt.err (!%p319_p7)
}
  0x11   :  { %s374_s11 = smov 128   ;;  %s375_s12 = smov 8  }
  0x12   :  { %32 = dma.hbm_to_vmem [thread:$0]  %s478_s2, 256, %s27_s25, [#allocation4], %s374_s11, %s374_s11, %s375_s12  }
  0x13   :  { %367 = dma.done.wait [#allocation4], 256  }
  0x14   :  { %368 = vsyncadd [#allocation4], 4294967040  ;;  %v376_v0 = vmov 0   ;;  %v377_v1 = vmov 0.0|0.0   ;;  %v40_v2 = vld [vmem:[%s476_s0] sm:$0xff]  ;;  %v50_v4 = vld [vmem:[%s477_s1 + $0x8] sm:$0xff]  ;;  %v41_v10 = vlaneseq }
  0x15   :  { %296 = vset.pattern.permute.xlu0 %v376_v0  ;;  %281 = vmatprep.subr.bf16.mxu0 %v377_v1  ;;  %v49_v3 = vld [vmem:[%s477_s1] sm:$0xff]  ;;  %v126_v7 = vld [vmem:[#allocation3 + $0x8] sm:$0xff]  ;;  %vm378_vm0 = vmmov 0   ;;  %v379_v9 = vmov 0.0   ;;  %vm51_vm1 = vcmask 130048   ;;  %vm197_vm3 = vcmask 261120  }
  0x16   :  { %284 = vmatprep.subr.bf16.mxu1 %v377_v1  ;;  %44 = vperm.xlu0 %296, %v40_v2   ;;  %v282_v5 = vpack.c.bf16 %v50_v4, %v49_v3  ;;  %v125_v6 = vld [vmem:[#allocation3] sm:$0xff]  ;;  %v42_v11 = vand.u32 127, %v41_v10  ;;  %s380_s2 = smov [#allocation6]   ;;  %s381_s22 = smov [#allocation7]  }
  0x17   :  { %v285_v8 = vpack.c.bf16 %v126_v7, %v125_v6  ;;  %271 = vmatprep.mubr.msk.f32.mxu0 %vm378_vm0, %v379_v9  ;;  %278 = vmatprep.mubr.msk.f32.mxu1 %vm378_vm0, %v379_v9  ;;  %v259_v16 = vld [vmem:[%s479_s3] ss:$0 sm:$0xff]  ;;  %s229_s21 = sshll.u32 %s380_s2, 4  ;;  %s239_s23 = sshll.u32 %s381_s22, 4  ;;  %s230_s21 = int_to_ptr.vmem [resolvable:$true] %s229_s21  ;;  %s240_s23 = int_to_ptr.vmem [resolvable:$true] %s239_s23 }
  0x18   :  { %283 = vmatpush3.bf16.msra.mxu0 %v282_v5  ;;  %s323_s24 = scalar_lea.vmem %s230_s21, 128  ;;  %p328_p9 = scmp.lt.s32.totalorder %s230_s21, %s230_s21 }
  0x19   :  { %286 = vmatpush3.bf16.msra.mxu1 %v285_v8  ;;  %p324_p8 = scmp.ne.s32.totalorder %s230_s21, %s323_s24  ;;  %p329_p10 = scmp.lt.s32.totalorder %s323_s24, %s323_s24 }
  0x1b   :  { %p330_p11 = por %p329_p10, %p328_p9 }
  0x1d   :  { %p331_p12 = pnand %p330_p11, %p324_p8 }
  0x95   :  { %v45_v12 = vpop.permute.xlu0 %44 }
  0x96   :  { %vm46_vm2 = vcmp.eq.s32.totalorder %v42_v11, %v45_v12 }
  0x97   :  { %v256_v13 = vsel %vm46_vm2, 1.0, %v379_v9 }
  0x98   :  { %272 = vmatmul.mubr.msk.f32.vlgmr.msra.gmra.mrb[0].mxu0 %vm51_vm1, %v256_v13  ;;  %279 = vmatmul.mubr.msk.f32.vlgmr.msra.gmra.mrb[0].mxu1 %vm51_vm1, %v256_v13 }
 0x16b   :  { %v121_v14 = vpop.f32.mrb[0].mxu0  ;;  %v193_v15 = vpop.f32.mrb[0].mxu1 }
 0x16c   :  { %v200_v17 = vadd.f32 %v193_v15, %v121_v14  ;;  %v273_v18 = vpop.f32.mrb[1].mxu0  ;;  %v280_v19 = vpop.f32.mrb[1].mxu1  ;;  %198 = vst.msk [vmem:[#allocation6] sm:$0xff] %vm197_vm3, %v121_v14  ;;  %199 = vst.msk [vmem:[#allocation7] sm:$0xff] %vm197_vm3, %v193_v15 }
 0x16e   :  { %v208_v20 = vmul.f32 %v259_v16, %v200_v17 }
 0x170   :  { %v209_v21 = vsel %vm197_vm3, %v208_v20, 0.0 }
 0x171   :  { %210 = vadd.xlane.f32.xlu0 %v209_v21 }
 0x172   :  { %334 = shalt.err (!%p331_p12)
}
 0x173   :  { %s335_s26 = scalar_lea.hbm %s481_s5, 128 }
 0x174   :  { %p336_p13 = scmp.ne.s32.totalorder %s481_s5, %s335_s26  ;;  %p339_p0 = scmp.lt.u32.totalorder %s335_s26, %s481_s5 }
 0x176   :  { %p341_p1 = pnand %p339_p0, %p336_p13 }
 0x178   :  { %344 = shalt.err (!%p341_p1)
}
 0x179   :  { %232 = dma.vmem_to_hbm [thread:$0]  %s230_s21, 128, %s481_s5, [#allocation5]  }
 0x17a   :  { %s345_s10 = scalar_lea.vmem %s240_s23, 128  ;;  %p350_p3 = scmp.lt.s32.totalorder %s240_s23, %s240_s23 }
 0x17b   :  { %p346_p2 = scmp.ne.s32.totalorder %s240_s23, %s345_s10  ;;  %p351_p4 = scmp.lt.s32.totalorder %s345_s10, %s345_s10 }
 0x17d   :  { %p352_p5 = por %p351_p4, %p350_p3 }
 0x17f   :  { %p353_p6 = pnand %p352_p5, %p346_p2 }
 0x181   :  { %356 = shalt.err (!%p353_p6)
}
 0x182   :  { %s357_s13 = scalar_lea.hbm %s482_s6, 128 }
 0x183   :  { %p358_p7 = scmp.ne.s32.totalorder %s482_s6, %s357_s13  ;;  %p361_p8 = scmp.lt.u32.totalorder %s357_s13, %s482_s6 }
 0x185   :  { %p363_p9 = pnand %p361_p8, %p358_p7 }
 0x187   :  { %366 = shalt.err (!%p363_p9)
}
 0x188   :  { %242 = dma.vmem_to_hbm [thread:$0]  %s240_s23, 128, %s482_s6, [#allocation8]   ;;  %v213_v22 = vstv %s480_s4  ;;  %vm221_vm4 = vcmask 7168  }
 0x1fe   :  { %v211_v23 = vpop.xlane.xlu0 %210 }
 0x1ff   :  { %v214_v24 = vadd.f32 %v213_v22, %v211_v23 }
 0x201   :  { %v260_v25 = vmul.f32 -1.442695, %v214_v24 }
 0x203   :  { %297 = vpow2.f32 %v260_v25 }
 0x20d   :  { %v298_v26 = vpop.eup %297 }
 0x20e   :  { %v218_v27 = vadd.f32 1.0, %v298_v26 }
 0x210   :  { %299 = vrcp.f32 %v218_v27 }
 0x21a   :  { %v300_v28 = vpop.eup %299 }
 0x21b   :  { %222 = vst.msk [vmem:[%s483_s7] sm:$0xff] %vm221_vm4, %v300_v28 }
 0x21c   :  { %369 = dma.done.wait [#allocation5], 128  }
 0x21d   :  { %370 = vsyncadd [#allocation5], 4294967168 }
 0x21e   :  { %371 = dma.done.wait [#allocation8], 128  }
 0x21f   :  { %372 = vsyncadd [#allocation8], 4294967168 }
 0x220   :  { %253 = vsyncpa [#allocation4], 1 }
 0x221   :  { %254 = vsyncpa [#allocation5], 1 }
 0x222   :  { %255 = vsyncpa [#allocation8], 1 }

</bundles_post_ra>
